<compile_context>
chip_gen: v7x
topology: tpu7x:2x2x1
jax: 0.10.0
libtpu: 0.0.40
codegen_flags: <defaults>
</compile_context>

<pallas_src>
import jax
import jax.numpy as jnp
from jax.experimental import pallas as pl
from jax.experimental.pallas import tpu as pltpu

TWO_48_MINUS_1 = float(2 ** 48 - 1)


# ----------------------------- slab layout helpers ---------------------------

def _ceil8(n):
    return -(-n // 8) * 8


def _offsets(row_sizes):
    """8-row-aligned offsets for stacked 2-D [r_i, H] pieces."""
    offs, cur = [], 0
    for r in row_sizes:
        offs.append(cur)
        cur = _ceil8(cur + r)
    return offs, cur


def _mlp_rows(h, ed):
    # id_w1, id_b1, id_w2, id_b2, edge_w1, edge_b1, edge_w2, edge_b2
    return [1, 1, h, 1, ed, 1, h, 1]


def _conv_rows(h):
    # w1_self, w1_nbr, b1, w2_self, w2_nbr, b2
    return [h, h, 1, h, h, 1]


# --------------------------------- kernel ------------------------------------

def _make_kernel(n, e, b, h, ed):
    n2, e2 = 2 * n, 2 * e
    mo, _ = _offsets(_mlp_rows(h, ed))
    co, _ = _offsets(_conv_rows(h))

    def kernel(gfeat_ref, src_ref, dst_ref, pool_ref, mlpw_ref, convw_ref, o_ref):
        # ---- shared id-MLP, batched over the stacked [2N] nodes ------------
        ids = gfeat_ref[0:n2, 0:1]                                       # [2N,1]
        norm = jnp.clip((ids + 2.0) / TWO_48_MINUS_1, 0.0, 1.0)
        id_w1 = mlpw_ref[mo[0]:mo[0] + 1, :]
        id_b1 = mlpw_ref[mo[1]:mo[1] + 1, :]
        id_w2 = mlpw_ref[mo[2]:mo[2] + h, :]
        id_b2 = mlpw_ref[mo[3]:mo[3] + 1, :]
        h_id = jnp.maximum(norm * id_w1 + id_b1, 0.0)                    # [2N,H]
        x = jnp.dot(h_id, id_w2, preferred_element_type=jnp.float32) + id_b2

        # ---- shared edge-MLP, batched over the stacked [2E] edges ----------
        eattr = gfeat_ref[n2:n2 + e2, :]                                 # [2E,ED]
        e_w1 = mlpw_ref[mo[4]:mo[4] + ed, :]
        e_b1 = mlpw_ref[mo[5]:mo[5] + 1, :]
        e_w2 = mlpw_ref[mo[6]:mo[6] + h, :]
        e_b2 = mlpw_ref[mo[7]:mo[7] + 1, :]
        h_e = jnp.maximum(jnp.dot(eattr, e_w1,
                                  preferred_element_type=jnp.float32) + e_b1, 0.0)
        e_emb = jnp.dot(h_e, e_w2, preferred_element_type=jnp.float32) + e_b2  # [2E,H]

        # ---- block-diagonal one-hot gather/scatter, built once -------------
        gmat = (jax.lax.broadcasted_iota(jnp.int32, (e2, n2), 1)
                == src_ref[...]).astype(jnp.float32)                     # [2E,2N]
        smat = (jax.lax.broadcasted_iota(jnp.int32, (n2, e2), 0)
                == dst_ref[...]).astype(jnp.float32)                     # [2N,2E]

        def conv(x_in, layer):
            # gather x[src] (MXU), relu(x_src + e), scatter-add to dst (MXU)
            x_src = jnp.dot(gmat, x_in, preferred_element_type=jnp.float32)   # [2E,H]
            msg = jnp.maximum(x_src + e_emb, 0.0)
            agg = jnp.dot(smat, msg, preferred_element_type=jnp.float32)      # [2N,H]
            base = 3 * layer
            outs = []
            for enc in range(2):                 # static unroll: s rows, then g rows
                wslf = convw_ref[enc, co[base]:co[base] + h, :]
                wnbr = convw_ref[enc, co[base + 1]:co[base + 1] + h, :]
                bias = convw_ref[enc, co[base + 2]:co[base + 2] + 1, :]
                lo = enc * n
                # two accumulated dots -- no lane-axis concat
                outs.append(jnp.dot(x_in[lo:lo + n], wslf,
                                    preferred_element_type=jnp.float32)
                            + jnp.dot(agg[lo:lo + n], wnbr,
                                      preferred_element_type=jnp.float32)
                            + bias)
            return jnp.maximum(jnp.concatenate(outs, axis=0), 0.0)       # [2N,H]

        x = conv(x, 0)
        x = conv(x, 1)

        # ---- pre-scaled block-diagonal mean-pool: one MXU dot --------------
        o_ref[...] = jnp.dot(pool_ref[...], x, preferred_element_type=jnp.float32)

    return kernel


def fused_encoders(gfeat, src, dst, pool, mlp_slab, conv_slab):
    e = src.shape[0] // 2
    n = (gfeat.shape[0] - src.shape[0]) // 2
    ed = gfeat.shape[1]
    h = mlp_slab.shape[1]
    b = pool.shape[0] // 2
    vmem = pltpu.MemorySpace.VMEM
    return pl.pallas_call(
        _make_kernel(n, e, b, h, ed),
        out_shape=jax.ShapeDtypeStruct((2 * b, h), jnp.float32),
        in_specs=[pl.BlockSpec(memory_space=vmem)] * 6,
        out_specs=pl.BlockSpec(memory_space=vmem),
    )(gfeat, src, dst, pool, mlp_slab, conv_slab)


# ------------------------------- model glue ----------------------------------

def init_params(key, hidden=32, edge_dim=4):
    ks = jax.random.split(key, 24)
    w = lambda k, s: jax.random.normal(k, s, jnp.float32) * 0.1
    p = {}
    p["id_w1"], p["id_b1"] = w(ks[0], (1, hidden)), w(ks[1], (1, hidden))
    p["id_w2"], p["id_b2"] = w(ks[2], (hidden, hidden)), w(ks[3], (1, hidden))
    p["edge_w1"], p["edge_b1"] = w(ks[4], (edge_dim, hidden)), w(ks[5], (1, hidden))
    p["edge_w2"], p["edge_b2"] = w(ks[6], (hidden, hidden)), w(ks[7], (1, hidden))
    for name, base in (("s1", 8), ("s2", 11), ("g1", 14), ("g2", 17)):
        p[name + "_wself"] = w(ks[base], (hidden, hidden))
        p[name + "_wnbr"] = w(ks[base + 1], (hidden, hidden))
        p[name + "_b"] = w(ks[base + 2], (1, hidden))
    p["reg_w1"], p["reg_b1"] = w(ks[20], (2 * hidden + 1, hidden)), w(ks[21], (1, hidden))
    p["reg_w2"], p["reg_b2"] = w(ks[22], (hidden, 1)), w(ks[23], (1, 1))
    return p


def prepack(p):
    """One-time weight packing (hoisted out of the per-call path)."""
    h = p["id_w2"].shape[0]
    ed = p["edge_w1"].shape[0]

    def slab(pieces, rows):
        offs, total = _offsets(rows)
        s = jnp.zeros((total, h), jnp.float32)
        for a, o in zip(pieces, offs):
            s = s.at[o:o + a.shape[0]].set(a.astype(jnp.float32))
        return s

    mlp_slab = slab([p["id_w1"], p["id_b1"], p["id_w2"], p["id_b2"],
                     p["edge_w1"], p["edge_b1"], p["edge_w2"], p["edge_b2"]],
                    _mlp_rows(h, ed))
    conv_slab = jnp.stack([
        slab([p[k + "1_wself"], p[k + "1_wnbr"], p[k + "1_b"],
              p[k + "2_wself"], p[k + "2_wnbr"], p[k + "2_b"]], _conv_rows(h))
        for k in ("s", "g")])
    return {"mlp_slab": mlp_slab, "conv_slab": conv_slab,
            "reg_w1": p["reg_w1"], "reg_b1": p["reg_b1"],
            "reg_w2": p["reg_w2"], "reg_b2": p["reg_b2"]}


def make_forward(num_graphs):
    bsz = int(num_graphs)

    @jax.jit
    def fwd(w, s_node_ids, s_edge_index, s_edge_attr, s_batch, depth,
            g_node_ids, g_edge_index, g_edge_attr, g_batch):
        n = s_node_ids.shape[0]
        e = s_edge_index.shape[1]
        ed = s_edge_attr.shape[1]

        # --- graph feature slab [2N+2E, ED] ---------------------------------
        ids = jnp.concatenate([s_node_ids, g_node_ids]).astype(jnp.float32)
        eattr = jnp.concatenate([s_edge_attr, g_edge_attr]).astype(jnp.float32)
        gfeat = jnp.zeros((2 * n + 2 * e, ed), jnp.float32)
        gfeat = gfeat.at[:2 * n, 0].set(ids)
        gfeat = gfeat.at[2 * n:, :].set(eattr)

        # --- edge indices (g offset by N -> block-diagonal stacked graph) ---
        src = jnp.concatenate([s_edge_index[0], g_edge_index[0] + n]
                              ).astype(jnp.int32).reshape(-1, 1)          # [2E,1]
        dst = jnp.concatenate([s_edge_index[1], g_edge_index[1] + n]
                              ).astype(jnp.int32).reshape(1, -1)          # [1,2E]

        # --- pre-scaled block-diagonal mean-pool matrix [2B, 2N] ------------
        def pool_rows(batch):
            oh = (batch.astype(jnp.int32)[None, :]
                  == jnp.arange(bsz, dtype=jnp.int32)[:, None]).astype(jnp.float32)
            cnt = jnp.sum(oh, axis=1, keepdims=True)
            return oh / jnp.maximum(cnt, 1.0)
        pool = jnp.zeros((2 * bsz, 2 * n), jnp.float32)
        pool = pool.at[:bsz, :n].set(pool_rows(s_batch))
        pool = pool.at[bsz:, n:].set(pool_rows(g_batch))

        emb = fused_encoders(gfeat, src, dst, pool,
                             w["mlp_slab"], w["conv_slab"])               # [2B,H]

        rep = jnp.concatenate([emb[:bsz], emb[bsz:]], axis=1)             # [B,2H]
        z = jnp.concatenate([rep, depth.astype(jnp.float32).reshape(-1, 1)], axis=1)
        # tiny regressor: plain XLA (a dedicated kernel launch is pure overhead)
        out = jnp.maximum(z @ w["reg_w1"] + w["reg_b1"], 0.0) @ w["reg_w2"] + w["reg_b2"]
        return out[:, 0]                                                  # .squeeze(1)

    return fwd


# ----------------------------- pure-JAX reference ----------------------------

def _ref_mlp2(x, w1, b1, w2, b2):
    return jnp.maximum(x @ w1 + b1, 0.0) @ w2 + b2


def _ref_encode(p, prefix, node_ids, edge_index, edge_attr, batch, bsz):
    norm = jnp.clip((node_ids.astype(jnp.float32) + 2.0) / TWO_48_MINUS_1,
                    0.0, 1.0)[:, None]
    x = jnp.maximum(norm * p["id_w1"] + p["id_b1"], 0.0) @ p["id_w2"] + p["id_b2"]
    e = _ref_mlp2(edge_attr.astype(jnp.float32),
                  p["edge_w1"], p["edge_b1"], p["edge_w2"], p["edge_b2"])
    src, dst = edge_index[0], edge_index[1]
    for layer in ("1", "2"):
        msg = jnp.maximum(x[src] + e, 0.0)
        agg = jax.ops.segment_sum(msg, dst, num_segments=x.shape[0])
        x = jnp.maximum(x @ p[prefix + layer + "_wself"]
                        + agg @ p[prefix + layer + "_wnbr"]
                        + p[prefix + layer + "_b"], 0.0)
    sums = jax.ops.segment_sum(x, batch, num_segments=bsz)
    cnts = jax.ops.segment_sum(jnp.ones((x.shape[0], 1), jnp.float32),
                               batch, num_segments=bsz)
    return sums / jnp.maximum(cnts, 1.0)


def ref_forward(p, s_node_ids, s_edge_index, s_edge_attr, s_batch, depth,
                g_node_ids, g_edge_index, g_edge_attr, g_batch, bsz):
    s_emb = _ref_encode(p, "s", s_node_ids, s_edge_index, s_edge_attr, s_batch, bsz)
    g_emb = _ref_encode(p, "g", g_node_ids, g_edge_index, g_edge_attr, g_batch, bsz)
    z = jnp.concatenate([s_emb, g_emb, depth.astype(jnp.float32).reshape(-1, 1)], axis=1)
    return _ref_mlp2(z, p["reg_w1"], p["reg_b1"], p["reg_w2"], p["reg_b2"])[:, 0]


# ----------------------------------- main -------------------------------------

if __name__ == "__main__":
    N, E, B, H, ED = 16, 32, 2, 32, 4

    key = jax.random.PRNGKey(0)
    kp, k0, k1, k2, k3, k4, k5, k6 = jax.random.split(key, 8)

    params = init_params(kp, hidden=H, edge_dim=ED)
    weights = prepack(params)              # one-time packing (outside jit)
    forward = make_forward(B)              # jitted per-call path

    # node ids are large integers in the torch model; represented as float32 here
    s_node_ids = jax.random.randint(k0, (N,), 0, 1_000_000).astype(jnp.float32)
    s_edge_index = jax.random.randint(k1, (2, E), 0, N, dtype=jnp.int32)
    s_edge_attr = jax.random.normal(k2, (E, ED), jnp.float32)
    s_batch = jnp.concatenate([jnp.zeros(N // 2, jnp.int32), jnp.ones(N // 2, jnp.int32)])

    g_node_ids = jax.random.randint(k3, (N,), 0, 1_000_000).astype(jnp.float32)
    g_edge_index = jax.random.randint(k4, (2, E), 0, N, dtype=jnp.int32)
    g_edge_attr = jax.random.normal(k5, (E, ED), jnp.float32)
    g_batch = jnp.concatenate([jnp.zeros(N // 2, jnp.int32), jnp.ones(N // 2, jnp.int32)])

    depth = jax.random.uniform(k6, (B,), jnp.float32) * 10.0

    out = forward(weights, s_node_ids, s_edge_index, s_edge_attr, s_batch, depth,
                  g_node_ids, g_edge_index, g_edge_attr, g_batch)
    out = jax.block_until_ready(out)

    ref = ref_forward(params, s_node_ids, s_edge_index, s_edge_attr, s_batch, depth,
                      g_node_ids, g_edge_index, g_edge_attr, g_batch, B)
    ref = jax.block_until_ready(ref)

    assert out.shape == (B,), f"bad output shape {out.shape}"
    assert jnp.allclose(out, ref, rtol=2e-3, atol=2e-3), (out, ref)
    print("KERNEL_OK")
</pallas_src>

<mosaic_0001>
module attributes {stable_mosaic.version = 11 : i64} {
  func.func @kernel(%arg0: memref<96x4xf32, #tpu.memory_space<vmem>>, %arg1: memref<64x1xi32, #tpu.memory_space<vmem>>, %arg2: memref<1x64xi32, #tpu.memory_space<vmem>>, %arg3: memref<4x32xf32, #tpu.memory_space<vmem>>, %arg4: memref<112x32xf32, #tpu.memory_space<vmem>>, %arg5: memref<2x144x32xf32, #tpu.memory_space<vmem>>, %arg6: memref<4x32xf32, #tpu.memory_space<vmem>>) attributes {dimension_semantics = [], scalar_prefetch = 0 : i64, scratch_operands = 0 : i64, tpu.core_type = #tpu.core_type<tc>} {
    %c0 = arith.constant 0 : index
    %c0_0 = arith.constant 0 : index
    %0 = vector.load %arg0[%c0, %c0_0] : memref<96x4xf32, #tpu.memory_space<vmem>>, vector<32x1xf32>
    %cst = arith.constant 2.000000e+00 : f32
    %1 = vector.broadcast %cst : f32 to vector<32x1xf32>
    %2 = arith.addf %0, %1 : vector<32x1xf32>
    %cst_1 = arith.constant 2.81474977E+14 : f32
    %3 = vector.broadcast %cst_1 : f32 to vector<32x1xf32>
    %4 = arith.divf %2, %3 : vector<32x1xf32>
    %cst_2 = arith.constant 0.000000e+00 : f32
    %cst_3 = arith.constant 1.000000e+00 : f32
    %5 = vector.broadcast %cst_2 : f32 to vector<32x1xf32>
    %6 = arith.maximumf %5, %4 : vector<32x1xf32>
    %7 = vector.broadcast %cst_3 : f32 to vector<32x1xf32>
    %8 = arith.minimumf %7, %6 : vector<32x1xf32>
    %c0_4 = arith.constant 0 : index
    %c0_5 = arith.constant 0 : index
    %9 = vector.load %arg4[%c0_4, %c0_5] : memref<112x32xf32, #tpu.memory_space<vmem>>, vector<1x32xf32>
    %c8 = arith.constant 8 : index
    %c0_6 = arith.constant 0 : index
    %10 = vector.load %arg4[%c8, %c0_6] : memref<112x32xf32, #tpu.memory_space<vmem>>, vector<1x32xf32>
    %c16 = arith.constant 16 : index
    %c0_7 = arith.constant 0 : index
    %11 = vector.load %arg4[%c16, %c0_7] : memref<112x32xf32, #tpu.memory_space<vmem>>, vector<32x32xf32>
    %c48 = arith.constant 48 : index
    %c0_8 = arith.constant 0 : index
    %12 = vector.load %arg4[%c48, %c0_8] : memref<112x32xf32, #tpu.memory_space<vmem>>, vector<1x32xf32>
    %13 = vector.broadcast %8 : vector<32x1xf32> to vector<32x32xf32>
    %14 = vector.broadcast %9 : vector<1x32xf32> to vector<32x32xf32>
    %15 = arith.mulf %13, %14 : vector<32x32xf32>
    %16 = vector.broadcast %10 : vector<1x32xf32> to vector<32x32xf32>
    %17 = arith.addf %15, %16 : vector<32x32xf32>
    %cst_9 = arith.constant 0.000000e+00 : f32
    %18 = vector.broadcast %cst_9 : f32 to vector<32x32xf32>
    %19 = arith.maximumf %17, %18 : vector<32x32xf32>
    %cst_10 = arith.constant dense<0.000000e+00> : vector<32x32xf32>
    %20 = tpu.matmul %19, %11, %cst_10 {dimension_numbers = #tpu.dot_dimension_numbers<[1], [0], [0], [1], [0, 0, 1, 1], [], []>} : vector<32x32xf32>, vector<32x32xf32>, vector<32x32xf32> -> vector<32x32xf32>
    %21 = vector.broadcast %12 : vector<1x32xf32> to vector<32x32xf32>
    %22 = arith.addf %20, %21 : vector<32x32xf32>
    %c32 = arith.constant 32 : index
    %c0_11 = arith.constant 0 : index
    %23 = vector.load %arg0[%c32, %c0_11] : memref<96x4xf32, #tpu.memory_space<vmem>>, vector<64x4xf32>
    %c56 = arith.constant 56 : index
    %c0_12 = arith.constant 0 : index
    %24 = vector.load %arg4[%c56, %c0_12] : memref<112x32xf32, #tpu.memory_space<vmem>>, vector<4x32xf32>
    %c64 = arith.constant 64 : index
    %c0_13 = arith.constant 0 : index
    %25 = vector.load %arg4[%c64, %c0_13] : memref<112x32xf32, #tpu.memory_space<vmem>>, vector<1x32xf32>
    %c72 = arith.constant 72 : index
    %c0_14 = arith.constant 0 : index
    %26 = vector.load %arg4[%c72, %c0_14] : memref<112x32xf32, #tpu.memory_space<vmem>>, vector<32x32xf32>
    %c104 = arith.constant 104 : index
    %c0_15 = arith.constant 0 : index
    %27 = vector.load %arg4[%c104, %c0_15] : memref<112x32xf32, #tpu.memory_space<vmem>>, vector<1x32xf32>
    %cst_16 = arith.constant dense<0.000000e+00> : vector<64x32xf32>
    %28 = tpu.matmul %23, %24, %cst_16 {dimension_numbers = #tpu.dot_dimension_numbers<[1], [0], [0], [1], [0, 0, 1, 1], [], []>} : vector<64x4xf32>, vector<4x32xf32>, vector<64x32xf32> -> vector<64x32xf32>
    %29 = vector.broadcast %25 : vector<1x32xf32> to vector<64x32xf32>
    %30 = arith.addf %28, %29 : vector<64x32xf32>
    %cst_17 = arith.constant 0.000000e+00 : f32
    %31 = vector.broadcast %cst_17 : f32 to vector<64x32xf32>
    %32 = arith.maximumf %30, %31 : vector<64x32xf32>
    %cst_18 = arith.constant dense<0.000000e+00> : vector<64x32xf32>
    %33 = tpu.matmul %32, %26, %cst_18 {dimension_numbers = #tpu.dot_dimension_numbers<[1], [0], [0], [1], [0, 0, 1, 1], [], []>} : vector<64x32xf32>, vector<32x32xf32>, vector<64x32xf32> -> vector<64x32xf32>
    %34 = vector.broadcast %27 : vector<1x32xf32> to vector<64x32xf32>
    %35 = arith.addf %33, %34 : vector<64x32xf32>
    %36 = tpu.iota {dimensions = array<i32: 1>} : vector<64x32xi32>
    %c0_19 = arith.constant 0 : index
    %c0_20 = arith.constant 0 : index
    %37 = vector.load %arg1[%c0_19, %c0_20] : memref<64x1xi32, #tpu.memory_space<vmem>>, vector<64x1xi32>
    %38 = vector.broadcast %37 : vector<64x1xi32> to vector<64x32xi32>
    %39 = arith.cmpi eq, %36, %38 : vector<64x32xi32>
    %40 = arith.extui %39 : vector<64x32xi1> to vector<64x32xi32>
    %41 = arith.sitofp %40 : vector<64x32xi32> to vector<64x32xf32>
    %42 = tpu.iota {dimensions = array<i32: 0>} : vector<32x64xi32>
    %c0_21 = arith.constant 0 : index
    %c0_22 = arith.constant 0 : index
    %43 = vector.load %arg2[%c0_21, %c0_22] : memref<1x64xi32, #tpu.memory_space<vmem>>, vector<1x64xi32>
    %44 = vector.broadcast %43 : vector<1x64xi32> to vector<32x64xi32>
    %45 = arith.cmpi eq, %42, %44 : vector<32x64xi32>
    %46 = arith.extui %45 : vector<32x64xi1> to vector<32x64xi32>
    %47 = arith.sitofp %46 : vector<32x64xi32> to vector<32x64xf32>
    %cst_23 = arith.constant dense<0.000000e+00> : vector<64x32xf32>
    %48 = tpu.matmul %41, %22, %cst_23 {dimension_numbers = #tpu.dot_dimension_numbers<[1], [0], [0], [1], [0, 0, 1, 1], [], []>} : vector<64x32xf32>, vector<32x32xf32>, vector<64x32xf32> -> vector<64x32xf32>
    %49 = arith.addf %48, %35 : vector<64x32xf32>
    %cst_24 = arith.constant 0.000000e+00 : f32
    %50 = vector.broadcast %cst_24 : f32 to vector<64x32xf32>
    %51 = arith.maximumf %49, %50 : vector<64x32xf32>
    %cst_25 = arith.constant dense<0.000000e+00> : vector<32x32xf32>
    %52 = tpu.matmul %47, %51, %cst_25 {dimension_numbers = #tpu.dot_dimension_numbers<[1], [0], [0], [1], [0, 0, 1, 1], [], []>} : vector<32x64xf32>, vector<64x32xf32>, vector<32x32xf32> -> vector<32x32xf32>
    %c0_26 = arith.constant 0 : index
    %c0_27 = arith.constant 0 : index
    %c0_28 = arith.constant 0 : index
    %53 = vector.load %arg5[%c0_26, %c0_27, %c0_28] : memref<2x144x32xf32, #tpu.memory_space<vmem>>, vector<1x32x32xf32>
    %54 = vector.shape_cast %53 : vector<1x32x32xf32> to vector<32x32xf32>
    %c0_29 = arith.constant 0 : index
    %c32_30 = arith.constant 32 : index
    %c0_31 = arith.constant 0 : index
    %55 = vector.load %arg5[%c0_29, %c32_30, %c0_31] : memref<2x144x32xf32, #tpu.memory_space<vmem>>, vector<1x32x32xf32>
    %56 = vector.shape_cast %55 : vector<1x32x32xf32> to vector<32x32xf32>
    %c0_32 = arith.constant 0 : index
    %c64_33 = arith.constant 64 : index
    %c0_34 = arith.constant 0 : index
    %57 = vector.load %arg5[%c0_32, %c64_33, %c0_34] : memref<2x144x32xf32, #tpu.memory_space<vmem>>, vector<1x1x32xf32>
    %58 = vector.shape_cast %57 : vector<1x1x32xf32> to vector<1x32xf32>
    %59 = vector.extract_strided_slice %22 {offsets = [0, 0], sizes = [16, 32], strides = [1, 1]} : vector<32x32xf32> to vector<16x32xf32>
    %cst_35 = arith.constant dense<0.000000e+00> : vector<16x32xf32>
    %60 = tpu.matmul %59, %54, %cst_35 {dimension_numbers = #tpu.dot_dimension_numbers<[1], [0], [0], [1], [0, 0, 1, 1], [], []>} : vector<16x32xf32>, vector<32x32xf32>, vector<16x32xf32> -> vector<16x32xf32>
    %61 = vector.extract_strided_slice %52 {offsets = [0, 0], sizes = [16, 32], strides = [1, 1]} : vector<32x32xf32> to vector<16x32xf32>
    %cst_36 = arith.constant dense<0.000000e+00> : vector<16x32xf32>
    %62 = tpu.matmul %61, %56, %cst_36 {dimension_numbers = #tpu.dot_dimension_numbers<[1], [0], [0], [1], [0, 0, 1, 1], [], []>} : vector<16x32xf32>, vector<32x32xf32>, vector<16x32xf32> -> vector<16x32xf32>
    %63 = arith.addf %60, %62 : vector<16x32xf32>
    %64 = vector.broadcast %58 : vector<1x32xf32> to vector<16x32xf32>
    %65 = arith.addf %63, %64 : vector<16x32xf32>
    %c1 = arith.constant 1 : index
    %c0_37 = arith.constant 0 : index
    %c0_38 = arith.constant 0 : index
    %66 = vector.load %arg5[%c1, %c0_37, %c0_38] : memref<2x144x32xf32, #tpu.memory_space<vmem>>, vector<1x32x32xf32>
    %67 = vector.shape_cast %66 : vector<1x32x32xf32> to vector<32x32xf32>
    %c1_39 = arith.constant 1 : index
    %c32_40 = arith.constant 32 : index
    %c0_41 = arith.constant 0 : index
    %68 = vector.load %arg5[%c1_39, %c32_40, %c0_41] : memref<2x144x32xf32, #tpu.memory_space<vmem>>, vector<1x32x32xf32>
    %69 = vector.shape_cast %68 : vector<1x32x32xf32> to vector<32x32xf32>
    %c1_42 = arith.constant 1 : index
    %c64_43 = arith.constant 64 : index
    %c0_44 = arith.constant 0 : index
    %70 = vector.load %arg5[%c1_42, %c64_43, %c0_44] : memref<2x144x32xf32, #tpu.memory_space<vmem>>, vector<1x1x32xf32>
    %71 = vector.shape_cast %70 : vector<1x1x32xf32> to vector<1x32xf32>
    %72 = vector.extract_strided_slice %22 {offsets = [16, 0], sizes = [16, 32], strides = [1, 1]} : vector<32x32xf32> to vector<16x32xf32>
    %cst_45 = arith.constant dense<0.000000e+00> : vector<16x32xf32>
    %73 = tpu.matmul %72, %67, %cst_45 {dimension_numbers = #tpu.dot_dimension_numbers<[1], [0], [0], [1], [0, 0, 1, 1], [], []>} : vector<16x32xf32>, vector<32x32xf32>, vector<16x32xf32> -> vector<16x32xf32>
    %74 = vector.extract_strided_slice %52 {offsets = [16, 0], sizes = [16, 32], strides = [1, 1]} : vector<32x32xf32> to vector<16x32xf32>
    %cst_46 = arith.constant dense<0.000000e+00> : vector<16x32xf32>
    %75 = tpu.matmul %74, %69, %cst_46 {dimension_numbers = #tpu.dot_dimension_numbers<[1], [0], [0], [1], [0, 0, 1, 1], [], []>} : vector<16x32xf32>, vector<32x32xf32>, vector<16x32xf32> -> vector<16x32xf32>
    %76 = arith.addf %73, %75 : vector<16x32xf32>
    %77 = vector.broadcast %71 : vector<1x32xf32> to vector<16x32xf32>
    %78 = arith.addf %76, %77 : vector<16x32xf32>
    %79 = tpu.concatenate %65, %78 in 0 : vector<16x32xf32>, vector<16x32xf32> -> vector<32x32xf32>
    %cst_47 = arith.constant 0.000000e+00 : f32
    %80 = vector.broadcast %cst_47 : f32 to vector<32x32xf32>
    %81 = arith.maximumf %79, %80 : vector<32x32xf32>
    %cst_48 = arith.constant dense<0.000000e+00> : vector<64x32xf32>
    %82 = tpu.matmul %41, %81, %cst_48 {dimension_numbers = #tpu.dot_dimension_numbers<[1], [0], [0], [1], [0, 0, 1, 1], [], []>} : vector<64x32xf32>, vector<32x32xf32>, vector<64x32xf32> -> vector<64x32xf32>
    %83 = arith.addf %82, %35 : vector<64x32xf32>
    %cst_49 = arith.constant 0.000000e+00 : f32
    %84 = vector.broadcast %cst_49 : f32 to vector<64x32xf32>
    %85 = arith.maximumf %83, %84 : vector<64x32xf32>
    %cst_50 = arith.constant dense<0.000000e+00> : vector<32x32xf32>
    %86 = tpu.matmul %47, %85, %cst_50 {dimension_numbers = #tpu.dot_dimension_numbers<[1], [0], [0], [1], [0, 0, 1, 1], [], []>} : vector<32x64xf32>, vector<64x32xf32>, vector<32x32xf32> -> vector<32x32xf32>
    %c0_51 = arith.constant 0 : index
    %c72_52 = arith.constant 72 : index
    %c0_53 = arith.constant 0 : index
    %87 = vector.load %arg5[%c0_51, %c72_52, %c0_53] : memref<2x144x32xf32, #tpu.memory_space<vmem>>, vector<1x32x32xf32>
    %88 = vector.shape_cast %87 : vector<1x32x32xf32> to vector<32x32xf32>
    %c0_54 = arith.constant 0 : index
    %c104_55 = arith.constant 104 : index
    %c0_56 = arith.constant 0 : index
    %89 = vector.load %arg5[%c0_54, %c104_55, %c0_56] : memref<2x144x32xf32, #tpu.memory_space<vmem>>, vector<1x32x32xf32>
    %90 = vector.shape_cast %89 : vector<1x32x32xf32> to vector<32x32xf32>
    %c0_57 = arith.constant 0 : index
    %c136 = arith.constant 136 : index
    %c0_58 = arith.constant 0 : index
    %91 = vector.load %arg5[%c0_57, %c136, %c0_58] : memref<2x144x32xf32, #tpu.memory_space<vmem>>, vector<1x1x32xf32>
    %92 = vector.shape_cast %91 : vector<1x1x32xf32> to vector<1x32xf32>
    %93 = vector.extract_strided_slice %81 {offsets = [0, 0], sizes = [16, 32], strides = [1, 1]} : vector<32x32xf32> to vector<16x32xf32>
    %cst_59 = arith.constant dense<0.000000e+00> : vector<16x32xf32>
    %94 = tpu.matmul %93, %88, %cst_59 {dimension_numbers = #tpu.dot_dimension_numbers<[1], [0], [0], [1], [0, 0, 1, 1], [], []>} : vector<16x32xf32>, vector<32x32xf32>, vector<16x32xf32> -> vector<16x32xf32>
    %95 = vector.extract_strided_slice %86 {offsets = [0, 0], sizes = [16, 32], strides = [1, 1]} : vector<32x32xf32> to vector<16x32xf32>
    %cst_60 = arith.constant dense<0.000000e+00> : vector<16x32xf32>
    %96 = tpu.matmul %95, %90, %cst_60 {dimension_numbers = #tpu.dot_dimension_numbers<[1], [0], [0], [1], [0, 0, 1, 1], [], []>} : vector<16x32xf32>, vector<32x32xf32>, vector<16x32xf32> -> vector<16x32xf32>
    %97 = arith.addf %94, %96 : vector<16x32xf32>
    %98 = vector.broadcast %92 : vector<1x32xf32> to vector<16x32xf32>
    %99 = arith.addf %97, %98 : vector<16x32xf32>
    %c1_61 = arith.constant 1 : index
    %c72_62 = arith.constant 72 : index
    %c0_63 = arith.constant 0 : index
    %100 = vector.load %arg5[%c1_61, %c72_62, %c0_63] : memref<2x144x32xf32, #tpu.memory_space<vmem>>, vector<1x32x32xf32>
    %101 = vector.shape_cast %100 : vector<1x32x32xf32> to vector<32x32xf32>
    %c1_64 = arith.constant 1 : index
    %c104_65 = arith.constant 104 : index
    %c0_66 = arith.constant 0 : index
    %102 = vector.load %arg5[%c1_64, %c104_65, %c0_66] : memref<2x144x32xf32, #tpu.memory_space<vmem>>, vector<1x32x32xf32>
    %103 = vector.shape_cast %102 : vector<1x32x32xf32> to vector<32x32xf32>
    %c1_67 = arith.constant 1 : index
    %c136_68 = arith.constant 136 : index
    %c0_69 = arith.constant 0 : index
    %104 = vector.load %arg5[%c1_67, %c136_68, %c0_69] : memref<2x144x32xf32, #tpu.memory_space<vmem>>, vector<1x1x32xf32>
    %105 = vector.shape_cast %104 : vector<1x1x32xf32> to vector<1x32xf32>
    %106 = vector.extract_strided_slice %81 {offsets = [16, 0], sizes = [16, 32], strides = [1, 1]} : vector<32x32xf32> to vector<16x32xf32>
    %cst_70 = arith.constant dense<0.000000e+00> : vector<16x32xf32>
    %107 = tpu.matmul %106, %101, %cst_70 {dimension_numbers = #tpu.dot_dimension_numbers<[1], [0], [0], [1], [0, 0, 1, 1], [], []>} : vector<16x32xf32>, vector<32x32xf32>, vector<16x32xf32> -> vector<16x32xf32>
    %108 = vector.extract_strided_slice %86 {offsets = [16, 0], sizes = [16, 32], strides = [1, 1]} : vector<32x32xf32> to vector<16x32xf32>
    %cst_71 = arith.constant dense<0.000000e+00> : vector<16x32xf32>
    %109 = tpu.matmul %108, %103, %cst_71 {dimension_numbers = #tpu.dot_dimension_numbers<[1], [0], [0], [1], [0, 0, 1, 1], [], []>} : vector<16x32xf32>, vector<32x32xf32>, vector<16x32xf32> -> vector<16x32xf32>
    %110 = arith.addf %107, %109 : vector<16x32xf32>
    %111 = vector.broadcast %105 : vector<1x32xf32> to vector<16x32xf32>
    %112 = arith.addf %110, %111 : vector<16x32xf32>
    %113 = tpu.concatenate %99, %112 in 0 : vector<16x32xf32>, vector<16x32xf32> -> vector<32x32xf32>
    %cst_72 = arith.constant 0.000000e+00 : f32
    %114 = vector.broadcast %cst_72 : f32 to vector<32x32xf32>
    %115 = arith.maximumf %113, %114 : vector<32x32xf32>
    %c0_73 = arith.constant 0 : index
    %c0_74 = arith.constant 0 : index
    %116 = vector.load %arg3[%c0_73, %c0_74] : memref<4x32xf32, #tpu.memory_space<vmem>>, vector<4x32xf32>
    %cst_75 = arith.constant dense<0.000000e+00> : vector<4x32xf32>
    %117 = tpu.matmul %116, %115, %cst_75 {dimension_numbers = #tpu.dot_dimension_numbers<[1], [0], [0], [1], [0, 0, 1, 1], [], []>} : vector<4x32xf32>, vector<32x32xf32>, vector<4x32xf32> -> vector<4x32xf32>
    %c0_76 = arith.constant 0 : index
    %c0_77 = arith.constant 0 : index
    %118 = vector.load %arg6[%c0_76, %c0_77] : memref<4x32xf32, #tpu.memory_space<vmem>>, vector<4x32xf32>
    tpu.vector_store %arg6[%c0_76, %c0_77], %117 {strides = array<i32>} : memref<4x32xf32, #tpu.memory_space<vmem>>, vector<4x32xf32>,
    return
  }
}

</mosaic_0001>

<bundles_post_ra>
// kernel: fwd.1
= control target key start
LH: loop header
LB: loop body
LE: loop exit
PB: predicated region body
PF: predicated region fallthrough
CT: control target
= control target key end

     0   :  { %v2408_v0 = vmov 0   ;;  %vm237_vm0 = vcmask 1043456   ;;  %vm212_vm1 = vcmask 31744   ;;  %v487_v50 = vlaneseq  ;;  %s2900_s0 = inlined_call_operand.vmem [shape: f32[96,4], index: 0, kind: input, shape index: {}]   ;;  %s2901_s4 = inlined_call_operand.vmem [shape: f32[112,32], index: 4, kind: input, shape index: {}]   ;;  %s2902_s1 = inlined_call_operand.vmem [shape: s32[64,1], index: 1, kind: input, shape index: {}]   ;;  %s2903_s2 = inlined_call_operand.vmem [shape: s32[1,64], index: 2, kind: input, shape index: {}]   ;;  %s2904_s5 = inlined_call_operand.vmem [shape: f32[2,144,32], index: 5, kind: input, shape index: {}]   ;;  %s2905_s3 = inlined_call_operand.vmem [shape: f32[4,32], index: 3, kind: input, shape index: {}]   ;;  %s2906_s6 = inlined_call_operand.vmem [shape: f32[4,32], index: 6, kind: output, shape index: {}]  }
   0x1   :  { %2407 = vset.pattern.permute.xlu1 %v2408_v0  ;;  %2406 = vset.pattern.permute.xlu0 %v2408_v0  ;;  %v25_v1 = vld [vmem:[%s2900_s0 + $0x10] sm:$0xff]  ;;  %v23_v2 = vld [vmem:[%s2900_s0] sm:$0xff]  ;;  %v26_v3 = vld [vmem:[%s2900_s0 + $0x18] sm:$0xff]  ;;  %vm95_vm2 = vcmask 261120   ;;  %v2409_v0 = vmov 0.0   ;;  %vm704_vm12 = vcmask 523264  }
   0x2   :  { %v29_v4 = vadd.f32 2.0, %v25_v1  ;;  %v27_v5 = vadd.f32 2.0, %v23_v2  ;;  %v30_v6 = vadd.f32 2.0, %v26_v3  ;;  %v24_v7 = vld [vmem:[%s2900_s0 + $0x8] sm:$0xff]  ;;  %v201_v13 = vld [vmem:[%s2901_s4 + $0x38] sm:$0xf] }
   0x3   :  { %v28_v8 = vadd.f32 2.0, %v24_v7  ;;  %v193_v14 = vld [vmem:[%s2900_s0 + $0x20] sm:$0xff]  ;;  %v194_v15 = vld [vmem:[%s2900_s0 + $0x28] sm:$0xff]  ;;  %2043 = vmatprep.subr.msk.mxu1 %vm237_vm0, %v201_v13  ;;  %v195_v22 = vld [vmem:[%s2900_s0 + $0x30] sm:$0xff]  ;;  %v2537_v58 = vand.u32 127, %v487_v50 }
   0x4   :  { %v34_v9 = vmul.f32 3.5527137e-15, %v29_v4  ;;  %v32_v10 = vmul.f32 3.5527137e-15, %v27_v5  ;;  %v35_v11 = vmul.f32 3.5527137e-15, %v30_v6  ;;  %2045 = vmatprep.mubr.msk.f32.mxu1 %vm212_vm1, %v193_v14  ;;  %2044 = vmatpush3.msk.msra.mxu1 %vm237_vm0, %v201_v13  ;;  %v46_v23 = vld [vmem:[%s2901_s4 + $0x10] sm:$0xff]  ;;  %v47_v24 = vld [vmem:[%s2901_s4 + $0x18] sm:$0xff]  ;;  %v197_v29 = vld [vmem:[%s2900_s0 + $0x40] sm:$0xff] }
   0x5   :  { %v33_v12 = vmul.f32 3.5527137e-15, %v28_v8  ;;  %2046 = vmatmul.mubr.msk.f32.vlgmr.msra.gmra.mrb[0].mxu1 %vm212_vm1, %v194_v15  ;;  %v196_v27 = vld [vmem:[%s2900_s0 + $0x38] sm:$0xff]  ;;  %v2260_v28 = vpack.c.bf16 %v47_v24, %v46_v23  ;;  %v48_v30 = vld [vmem:[%s2901_s4 + $0x20] sm:$0xff]  ;;  %v49_v31 = vld [vmem:[%s2901_s4 + $0x28] sm:$0xff]  ;;  %vm2411_vm0 = vmmov 0  }
   0x6   :  { %v38_v16 = vmax.f32 %v34_v9, 0.0  ;;  %v36_v17 = vmax.f32 %v32_v10, 0.0  ;;  %v39_v18 = vmax.f32 %v35_v11, 0.0  ;;  %2048 = vmatprep.mubr.msk.f32.mxu1 %vm212_vm1, %v195_v22  ;;  %v198_v32 = vld [vmem:[%s2900_s0 + $0x48] sm:$0xff]  ;;  %v2264_v33 = vpack.c.bf16 %v49_v31, %v48_v30  ;;  %v489_v35 = vld [vmem:[%s2902_s1] sm:$0xff]  ;;  %v199_v36 = vld [vmem:[%s2900_s0 + $0x50] sm:$0xff] }
   0x7   :  { %v37_v19 = vmax.f32 %v33_v12, 0.0  ;;  %2261 = vmatprep.subr.bf16.mxu0 %v2260_v28  ;;  %v490_v34 = vld [vmem:[%s2902_s1 + $0x8] sm:$0xff]  ;;  %v200_v37 = vld [vmem:[%s2900_s0 + $0x58] sm:$0xff]  ;;  %v491_v39 = vld [vmem:[%s2902_s1 + $0x10] sm:$0xff] }
   0x8   :  { %v42_v20 = vmin.f32 %v38_v16, 1.0  ;;  %v40_v21 = vmin.f32 %v36_v17, 1.0  ;;  %v43_v25 = vmin.f32 %v39_v18, 1.0  ;;  %2263 = vmatpush3.bf16.msra.mxu0 %v2260_v28  ;;  %v492_v38 = vld [vmem:[%s2902_s1 + $0x18] sm:$0xff]  ;;  %v494_v40 = vld [vmem:[%s2902_s1 + $0x28] sm:$0xff]  ;;  %v493_v41 = vld [vmem:[%s2902_s1 + $0x20] sm:$0xff] }
   0x9   :  { %v41_v26 = vmin.f32 %v37_v19, 1.0  ;;  %2049 = vmatmul.mubr.msk.f32.gmra.mrb[2].mxu1 %vm212_vm1, %v196_v27  ;;  %2265 = vmatprep.subr.bf16.mxu0 %v2264_v33  ;;  %v496_v42 = vld [vmem:[%s2902_s1 + $0x38] sm:$0xff]  ;;  %v495_v43 = vld [vmem:[%s2902_s1 + $0x30] sm:$0xff]  ;;  %v1797_v44 = vld [vmem:[%s2901_s4] ss:$0 sm:$0xff] }
   0xa   :  { %63 = vperm.xlu1 %2407, %v42_v20   ;;  %53 = vperm.xlu0 %2406, %v40_v21   ;;  %v1798_v45 = vld [vmem:[%s2901_s4 + $0x8] ss:$0 sm:$0xff]  ;;  %v204_v4 = vld [vmem:[%s2901_s4 + $0x50] sm:$0xff]  ;;  %v205_v7 = vld [vmem:[%s2901_s4 + $0x58] sm:$0xff] }
   0xb   :  { %2051 = vmatprep.mubr.msk.f32.mxu1 %vm212_vm1, %v197_v29  ;;  %v203_v3 = vld [vmem:[%s2901_s4 + $0x48] sm:$0xff]  ;;  %v206_v8 = vld [vmem:[%s2901_s4 + $0x60] sm:$0xff] }
   0xc   :  { %2267 = vmatpush3.bf16.msra.mxu0 %v2264_v33  ;;  %v2268_v5 = vpack.c.bf16 %v204_v4, %v203_v3  ;;  %v1804_v9 = vld [vmem:[%s2901_s4 + $0x40] ss:$0 sm:$0xff]  ;;  %v2272_v11 = vpack.c.bf16 %v206_v8, %v205_v7 }
   0xd   :  { %2052 = vmatmul.mubr.msk.f32.gmra.mrb[4].mxu1 %vm212_vm1, %v198_v32  ;;  %v2633_v7 = vld [vmem:[%s2903_s2] ss:$0 sm:$0xff] }
   0xe   :  { %68 = vperm.xlu1 %2407, %v43_v25   ;;  %58 = vperm.xlu0 %2406, %v41_v26  }
   0xf   :  { %2054 = vmatprep.mubr.msk.f32.mxu1 %vm212_vm1, %v199_v36  ;;  %2269 = vmatprep.subr.bf16.mxu0 %v2268_v5 }
  0x11   :  { %2055 = vmatmul.mubr.msk.f32.gmra.mrb[6].mxu1 %vm212_vm1, %v200_v37  ;;  %vm1791_vm1 = vcmask 257024  }
  0x12   :  { %501 = vperm.xlu1 %2407, %v490_v34   ;;  %498 = vperm.xlu0 %2406, %v489_v35   ;;  %v1799_v34 = vld [vmem:[%s2901_s4 + $0x30] ss:$0 sm:$0xff] }
  0x16   :  { %507 = vperm.xlu1 %2407, %v492_v38   ;;  %504 = vperm.xlu0 %2406, %v491_v39  }
  0x1a   :  { %513 = vperm.xlu1 %2407, %v494_v40   ;;  %510 = vperm.xlu0 %2406, %v493_v41  }
  0x1e   :  { %519 = vperm.xlu1 %2407, %v496_v42   ;;  %516 = vperm.xlu0 %2406, %v495_v43  }
  0x89   :  { %v64_v46 = vpop.permute.xlu1 %63  ;;  %v54_v47 = vpop.permute.xlu0 %53 }
  0x8a   :  { %v77_v48 = vmul.f32 %v1797_v44, %v64_v46  ;;  %v75_v49 = vmul.f32 %v1797_v44, %v54_v47 }
  0x8c   :  { %v83_v51 = vadd.f32 %v1798_v45, %v75_v49  ;;  %v85_v52 = vadd.f32 %v1798_v45, %v77_v48 }
  0x8d   :  { %v69_v53 = vpop.permute.xlu1 %68  ;;  %v59_v54 = vpop.permute.xlu0 %58 }
  0x8e   :  { %v78_v55 = vmul.f32 %v1797_v44, %v69_v53  ;;  %v76_v56 = vmul.f32 %v1797_v44, %v59_v54  ;;  %v87_v57 = vmax.f32 %v83_v51, 0.0  ;;  %v89_v60 = vmax.f32 %v85_v52, 0.0 }
  0x90   :  { %v84_v59 = vadd.f32 %v1798_v45, %v76_v56  ;;  %2037 = vmatprep.mubr.msk.f32.mxu0 %vm95_vm2, %v87_v57  ;;  %v86_v62 = vadd.f32 %v1798_v45, %v78_v55 }
  0x91   :  { %v499_v61 = vpop.permute.xlu0 %498  ;;  %v502_v36 = vpop.permute.xlu1 %501 }
  0x92   :  { %v88_v63 = vmax.f32 %v84_v59, 0.0  ;;  %vm521_vm3 = vcmp.eq.s32.totalorder %v2537_v58, %v499_v61  ;;  %v90_v2 = vmax.f32 %v86_v62, 0.0  ;;  %vm522_vm4 = vcmp.eq.s32.totalorder %v2537_v58, %v502_v36 }
  0x93   :  { %v2542_v1 = vsel %vm521_vm3, 1.0, %v2409_v0  ;;  %v2590_v49 = vsel %vm522_vm4, 1.0, %v2409_v0 }
  0x94   :  { %2038 = vmatmul.mubr.msk.f32.vlgmr.msra.gmra.mrb[0].mxu0 %vm95_vm2, %v88_v63  ;;  %2085 = vmatprep.mubr.msk.f32.mxu1 %vm95_vm2, %v2542_v1 }
  0x95   :  { %2040 = vmatprep.mubr.msk.f32.mxu0 %vm95_vm2, %v89_v60  ;;  %2271 = vmatpush3.bf16.msra.mxu0 %v2268_v5  ;;  %v505_v40 = vpop.permute.xlu0 %504  ;;  %v508_v46 = vpop.permute.xlu1 %507 }
  0x96   :  { %2273 = vmatprep.subr.bf16.mxu0 %v2272_v11  ;;  %vm523_vm5 = vcmp.eq.s32.totalorder %v2537_v58, %v505_v40  ;;  %vm524_vm6 = vcmp.eq.s32.totalorder %v2537_v58, %v508_v46 }
  0x97   :  { %v2594_v52 = vsel %vm523_vm5, 1.0, %v2409_v0  ;;  %v2602_v54 = vsel %vm524_vm6, 1.0, %v2409_v0 }
  0x98   :  { %2041 = vmatmul.mubr.msk.f32.gmra.mrb[2].mxu0 %vm95_vm2, %v90_v2 }
  0x99   :  { %2275 = vmatpush3.bf16.msra.mxu0 %v2272_v11  ;;  %v511_v48 = vpop.permute.xlu0 %510  ;;  %v514_v51 = vpop.permute.xlu1 %513  ;;  %v806_v11 = vld [vmem:[%s2904_s5 + $0x20] sm:$0xff] }
  0x9a   :  { %vm525_vm7 = vcmp.eq.s32.totalorder %v2537_v58, %v511_v48  ;;  %vm526_vm8 = vcmp.eq.s32.totalorder %v2537_v58, %v514_v51 }
  0x9b   :  { %v2606_v55 = vsel %vm525_vm7, 1.0, %v2409_v0  ;;  %v2614_v57 = vsel %vm526_vm8, 1.0, %v2409_v0 }
  0x9d   :  { %v517_v53 = vpop.permute.xlu0 %516  ;;  %v520_v56 = vpop.permute.xlu1 %519 }
  0x9e   :  { %vm527_vm9 = vcmp.eq.s32.totalorder %v2537_v58, %v517_v53  ;;  %vm528_vm10 = vcmp.eq.s32.totalorder %v2537_v58, %v520_v56 }
  0x9f   :  { %v2618_v59 = vsel %vm527_vm9, 1.0, %v2409_v0  ;;  %v2625_v60 = vsel %vm528_vm10, 1.0, %v2409_v0 }
  0xd8   :  { %v2047_v6 = vpop.f32.mrb[0].mxu1 }
  0xd9   :  { %v307_v10 = vpop.f32.mrb[1].mxu1  ;;  %v313_v13 = vadd.f32 %v2047_v6, %v1804_v9  ;;  %v546_v6 = vshrl.u32 %v487_v50, 7 }
  0xda   :  { %v308_v12 = vadd.f32 %v1804_v9, %v307_v10 }
  0xdb   :  { %v347_v16 = vmax.f32 %v313_v13, 0.0  ;;  %v2635_v8 = vadd.s32 8, %v546_v6  ;;  %vm555_vm11 = vcmp.eq.s32.totalorder %v546_v6, %v2633_v7  ;;  %v2645_v50 = vadd.s32 16, %v546_v6  ;;  %v808_v13 = vld [vmem:[%s2904_s5 + $0x30] sm:$0xff] }
  0xdc   :  { %v346_v14 = vmax.f32 %v308_v12, 0.0  ;;  %v2050_v15 = vpop.f32.mrb[2].mxu1  ;;  %v2647_v10 = vadd.s32 24, %v546_v6  ;;  %v807_v12 = vld [vmem:[%s2904_s5 + $0x28] sm:$0xff] }
  0xdd   :  { %v317_v17 = vpop.f32.mrb[3].mxu1  ;;  %v323_v18 = vadd.f32 %v2050_v15, %v1804_v9  ;;  %vm556_vm13 = vcmp.eq.s32.totalorder %v2635_v8, %v2633_v7  ;;  %vm557_vm14 = vcmp.eq.s32.totalorder %v2645_v50, %v2633_v7  ;;  %v809_v15 = vld [vmem:[%s2904_s5 + $0x38] sm:$0xff]  ;;  %v802_v50 = vld [vmem:[%s2904_s5] sm:$0xff] }
  0xde   :  { %v318_v19 = vadd.f32 %v1804_v9, %v317_v17  ;;  %2065 = vmatprep.mubr.msk.f32.mxu0 %vm95_vm2, %v346_v14  ;;  %vm558_vm15 = vcmp.eq.s32.totalorder %v2647_v10, %v2633_v7  ;;  %v2300_v14 = vpack.c.bf16 %v807_v12, %v806_v11  ;;  %v1814_v17 = vld [vmem:[%s2901_s4 + $0x68] ss:$0 sm:$0xff]  ;;  %v2702_v11 = vsel %vm556_vm13, 1.0, %v2409_v0 }
  0xdf   :  { %2066 = vmatmul.mubr.msk.f32.vlgmr.msra.gmra.mrb[4].mxu0 %vm95_vm2, %v347_v16  ;;  %v349_v20 = vmax.f32 %v323_v18, 0.0  ;;  %v2304_v16 = vpack.c.bf16 %v809_v15, %v808_v13  ;;  %v2708_v12 = vsel %vm557_vm14, 1.0, %v2409_v0  ;;  %v2718_v8 = vsel %vm558_vm15, 1.0, %v2409_v0  ;;  %v803_v13 = vld [vmem:[%s2904_s5 + $0x8] sm:$0xff] }
  0xe0   :  { %v348_v21 = vmax.f32 %v318_v19, 0.0  ;;  %v2053_v22 = vpop.f32.mrb[4].mxu1  ;;  %v2308_v15 = vpack.c.bf16 %v803_v13, %v802_v50  ;;  %v1860_v7 = vld [vmem:[%s2904_s5 + $0xc8] sm:$0xff] }
  0xe1   :  { %v333_v23 = vadd.f32 %v2053_v22, %v1804_v9  ;;  %v327_v24 = vpop.f32.mrb[5].mxu1 }
  0xe2   :  { %v328_v25 = vadd.f32 %v1804_v9, %v327_v24  ;;  %2068 = vmatprep.mubr.msk.f32.mxu0 %vm95_vm2, %v348_v21 }
  0xe3   :  { %v351_v26 = vmax.f32 %v333_v23, 0.0  ;;  %2069 = vmatmul.mubr.msk.f32.gmra.mrb[6].mxu0 %vm95_vm2, %v349_v20 }
  0xe4   :  { %v350_v27 = vmax.f32 %v328_v25, 0.0  ;;  %v2056_v28 = vpop.f32.mrb[6].mxu1 }
  0xe5   :  { %v343_v29 = vadd.f32 %v2056_v28, %v1804_v9  ;;  %v337_v30 = vpop.f32.mrb[7].mxu1 }
  0xe6   :  { %v338_v31 = vadd.f32 %v1804_v9, %v337_v30  ;;  %2071 = vmatprep.mubr.msk.f32.mxu0 %vm95_vm2, %v350_v27  ;;  %v2639_v9 = vsel %vm555_vm11, 1.0, %v2409_v0 }
  0xe7   :  { %v353_v32 = vmax.f32 %v343_v29, 0.0  ;;  %2072 = vmatmul.mubr.msk.f32.gmra.mrb[8].mxu0 %vm95_vm2, %v351_v26 }
  0xe8   :  { %v352_v33 = vmax.f32 %v338_v31, 0.0 }
  0xea   :  { %2074 = vmatprep.mubr.msk.f32.mxu0 %vm95_vm2, %v352_v33 }
  0xeb   :  { %2075 = vmatmul.mubr.msk.f32.gmra.mrb[10].mxu0 %vm95_vm2, %v353_v32 }
  0xec   :  { %2113 = vmatprep.mubr.msk.f32.mxu0 %vm704_vm12, %v2639_v9 }
 0x167   :  { %v2039_v35 = vpop.f32.mrb[0].mxu0 }
 0x168   :  { %v2575_v37 = vadd.f32 %v2039_v35, %v1799_v34  ;;  %v174_v38 = vpop.f32.mrb[1].mxu0 }
 0x169   :  { %v2577_v39 = vadd.f32 %v1799_v34, %v174_v38 }
 0x16b   :  { %v2276_v41 = vpack.c.bf16 %v2575_v37, %v2577_v39  ;;  %v2042_v42 = vpop.f32.mrb[2].mxu0 }
 0x16c   :  { %v2581_v43 = vadd.f32 %v2042_v42, %v1799_v34  ;;  %v184_v44 = vpop.f32.mrb[3].mxu0 }
 0x16d   :  { %v2583_v45 = vadd.f32 %v1799_v34, %v184_v44  ;;  %2277 = vmatprep.subr.bf16.mxu1 %v2276_v41 }
 0x16e   :  { %2279 = vmatpush3.bf16.msra.mxu1 %v2276_v41 }
 0x16f   :  { %v2280_v47 = vpack.c.bf16 %v2581_v43, %v2583_v45 }
 0x171   :  { %2281 = vmatprep.subr.bf16.mxu1 %v2280_v47 }
 0x172   :  { %2283 = vmatpush3.bf16.msra.mxu1 %v2280_v47 }
 0x173   :  { %2301 = vmatprep.subr.bf16.mxu1 %v2300_v14 }
 0x175   :  { %2086 = vmatmul.mubr.msk.f32.vlgmr.msra.gmra.mrb[8].mxu1 %vm95_vm2, %v2590_v49 }
 0x176   :  { %2088 = vmatprep.mubr.msk.f32.mxu1 %vm95_vm2, %v2594_v52  ;;  %2303 = vmatpush3.bf16.msra.mxu1 %v2300_v14  ;;  %v1859_v14 = vld [vmem:[%s2904_s5 + $0xc0] sm:$0xff] }
 0x177   :  { %2305 = vmatprep.subr.bf16.mxu1 %v2304_v16  ;;  %v2320_v10 = vpack.c.bf16 %v1860_v7, %v1859_v14 }
 0x179   :  { %2089 = vmatmul.mubr.msk.f32.gmra.mrb[10].mxu1 %vm95_vm2, %v2602_v54 }
 0x17a   :  { %2091 = vmatprep.mubr.msk.f32.mxu1 %vm95_vm2, %v2606_v55  ;;  %2307 = vmatpush3.bf16.msra.mxu1 %v2304_v16  ;;  %v1853_v16 = vld [vmem:[%s2904_s5 + $0x90] sm:$0xff] }
 0x17b   :  { %2309 = vmatprep.subr.bf16.mxu1 %v2308_v15 }
 0x17d   :  { %2092 = vmatmul.mubr.msk.f32.gmra.mrb[12].mxu1 %vm95_vm2, %v2614_v57 }
 0x17e   :  { %2094 = vmatprep.mubr.msk.f32.mxu1 %vm95_vm2, %v2618_v59 }
 0x181   :  { %2095 = vmatmul.mubr.msk.f32.gmra.mrb[14].mxu1 %vm95_vm2, %v2625_v60 }
 0x1b2   :  { %v2067_v61 = vpop.f32.mrb[4].mxu0 }
 0x1b3   :  { %v448_v62 = vpop.f32.mrb[5].mxu0  ;;  %v2668_v18 = vadd.f32 %v2067_v61, %v1814_v17 }
 0x1b4   :  { %v2670_v19 = vadd.f32 %v1814_v17, %v448_v62 }
 0x1b6   :  { %v2070_v63 = vpop.f32.mrb[6].mxu0 }
 0x1b7   :  { %v458_v2 = vpop.f32.mrb[7].mxu0  ;;  %v2674_v25 = vadd.f32 %v2070_v63, %v1814_v17 }
 0x1b8   :  { %v2676_v27 = vadd.f32 %v1814_v17, %v458_v2 }
 0x1ba   :  { %v2073_v58 = vpop.f32.mrb[8].mxu0 }
 0x1bb   :  { %v468_v3 = vpop.f32.mrb[9].mxu0  ;;  %v2680_v34 = vadd.f32 %v2073_v58, %v1814_v17  ;;  %v1857_v58 = vld [vmem:[%s2904_s5 + $0xb0] sm:$0xff] }
 0x1bc   :  { %v2682_v36 = vadd.f32 %v1814_v17, %v468_v3  ;;  %v1858_v3 = vld [vmem:[%s2904_s5 + $0xb8] sm:$0xff] }
 0x1bd   :  { %v2316_v6 = vpack.c.bf16 %v1858_v3, %v1857_v58 }
 0x1be   :  { %v2076_v4 = vpop.f32.mrb[10].mxu0 }
 0x1bf   :  { %v478_v5 = vpop.f32.mrb[11].mxu0  ;;  %v2686_v47 = vadd.f32 %v2076_v4, %v1814_v17 }
 0x1c0   :  { %v2688_v51 = vadd.f32 %v1814_v17, %v478_v5  ;;  %v1854_v17 = vld [vmem:[%s2904_s5 + $0x98] sm:$0xff] }
 0x248   :  { %v2087_v20 = vpop.f32.mrb[8].mxu1 }
 0x249   :  { %v663_v21 = vadd.f32 %v2087_v20, %v2668_v18  ;;  %v657_v22 = vpop.f32.mrb[9].mxu1  ;;  %v2324_v20 = vpack.c.bf16 %v1854_v17, %v1853_v16 }
 0x24a   :  { %v658_v23 = vadd.f32 %v657_v22, %v2670_v19  ;;  %v805_v22 = vld [vmem:[%s2904_s5 + $0x18] sm:$0xff] }
 0x24b   :  { %v697_v24 = vmax.f32 %v663_v21, 0.0  ;;  %v804_v21 = vld [vmem:[%s2904_s5 + $0x10] sm:$0xff] }
 0x24c   :  { %v696_v26 = vmax.f32 %v658_v23, 0.0  ;;  %v2090_v28 = vpop.f32.mrb[10].mxu1 }
 0x24d   :  { %v673_v29 = vadd.f32 %v2090_v28, %v2674_v25  ;;  %v667_v30 = vpop.f32.mrb[11].mxu1  ;;  %v1855_v28 = vld [vmem:[%s2904_s5 + $0xa0] sm:$0xff] }
 0x24e   :  { %v2284_v31 = vpack.c.bf16 %v697_v24, %v696_v26  ;;  %v668_v32 = vadd.f32 %v667_v30, %v2676_v27  ;;  %v2312_v26 = vpack.c.bf16 %v805_v22, %v804_v21 }
 0x24f   :  { %v699_v33 = vmax.f32 %v673_v29, 0.0  ;;  %v1856_v29 = vld [vmem:[%s2904_s5 + $0xa8] sm:$0xff] }
 0x250   :  { %v698_v35 = vmax.f32 %v668_v32, 0.0  ;;  %v2093_v38 = vpop.f32.mrb[12].mxu1  ;;  %2285 = vmatprep.subr.bf16.mxu0 %v2284_v31  ;;  %v2328_v32 = vpack.c.bf16 %v1856_v29, %v1855_v28  ;;  %v1890_v28 = vld [vmem:[%s2904_s5 + $0x108] sm:$0xff] }
 0x251   :  { %v683_v40 = vadd.f32 %v2093_v38, %v2680_v34  ;;  %v677_v41 = vpop.f32.mrb[13].mxu1  ;;  %2287 = vmatpush3.bf16.msra.mxu0 %v2284_v31 }
 0x252   :  { %v2288_v42 = vpack.c.bf16 %v699_v33, %v698_v35  ;;  %v678_v44 = vadd.f32 %v677_v41, %v2682_v36 }
 0x253   :  { %v701_v46 = vmax.f32 %v683_v40, 0.0 }
 0x254   :  { %v700_v48 = vmax.f32 %v678_v44, 0.0  ;;  %v2096_v53 = vpop.f32.mrb[14].mxu1  ;;  %2289 = vmatprep.subr.bf16.mxu0 %v2288_v42 }
 0x255   :  { %v693_v56 = vadd.f32 %v2096_v53, %v2686_v47  ;;  %v687_v61 = vpop.f32.mrb[15].mxu1  ;;  %2291 = vmatpush3.bf16.msra.mxu0 %v2288_v42 }
 0x256   :  { %v2292_v62 = vpack.c.bf16 %v701_v46, %v700_v48  ;;  %v688_v63 = vadd.f32 %v687_v61, %v2688_v51 }
 0x257   :  { %v703_v2 = vmax.f32 %v693_v56, 0.0 }
 0x258   :  { %v702_v4 = vmax.f32 %v688_v63, 0.0  ;;  %2293 = vmatprep.subr.bf16.mxu0 %v2292_v62 }
 0x259   :  { %2295 = vmatpush3.bf16.msra.mxu0 %v2292_v62 }
 0x25a   :  { %v2296_v5 = vpack.c.bf16 %v703_v2, %v702_v4 }
 0x25c   :  { %2297 = vmatprep.subr.bf16.mxu0 %v2296_v5 }
 0x25d   :  { %2299 = vmatpush3.bf16.msra.mxu0 %v2296_v5 }
 0x25e   :  { %2317 = vmatprep.subr.bf16.mxu0 %v2316_v6 }
 0x260   :  { %2114 = vmatmul.mubr.msk.f32.vlgmr.msra.gmra.mrb[12].mxu0 %vm704_vm12, %v2702_v11 }
 0x261   :  { %2116 = vmatprep.mubr.msk.f32.mxu0 %vm704_vm12, %v2708_v12  ;;  %2319 = vmatpush3.bf16.msra.mxu0 %v2316_v6 }
 0x262   :  { %2321 = vmatprep.subr.bf16.mxu0 %v2320_v10 }
 0x264   :  { %2117 = vmatmul.mubr.msk.f32.gmra.mrb[14].mxu0 %vm704_vm12, %v2718_v8 }
 0x265   :  { %2323 = vmatpush3.bf16.msra.mxu0 %v2320_v10 }
 0x266   :  { %2325 = vmatprep.subr.bf16.mxu0 %v2324_v20 }
 0x333   :  { %v2115_v23 = vpop.f32.mrb[12].mxu0 }
 0x334   :  { %v783_v24 = vpop.f32.mrb[13].mxu0 }
 0x335   :  { %2127 = vmatprep.mubr.msk.f32.mxu1 %vm95_vm2, %v783_v24 }
 0x336   :  { %2128 = vmatmul.mubr.msk.f32.vlgmr.msra.gmra.mrb[16].mxu1 %vm95_vm2, %v2115_v23 }
 0x337   :  { %v2118_v30 = vpop.f32.mrb[14].mxu0  ;;  %2311 = vmatpush3.bf16.msra.mxu1 %v2308_v15  ;;  %2138 = vmatprep.mubr.msk.f32.mxu1 %vm95_vm2, %v2577_v39  ;;  %v1852_v39 = vld [vmem:[%s2904_s5 + $0x40] ss:$0 sm:$0xff] }
 0x338   :  { %v793_v31 = vpop.f32.mrb[15].mxu0  ;;  %2313 = vmatprep.subr.bf16.mxu1 %v2312_v26 }
 0x339   :  { %2149 = vmatprep.mubr.msk.f32.mxu0 %vm95_vm2, %v793_v31 }
 0x33a   :  { %2150 = vmatmul.mubr.msk.f32.vlgmr.msra.gmra.mrb[16].mxu0 %vm95_vm2, %v2118_v30  ;;  %v1885_v30 = vld [vmem:[%s2904_s5 + $0xe0] sm:$0xff] }
 0x33b   :  { %2315 = vmatpush3.bf16.msra.mxu1 %v2312_v26  ;;  %2327 = vmatpush3.bf16.msra.mxu0 %v2324_v20 }
 0x33c   :  { %2160 = vmatprep.mubr.msk.f32.mxu0 %vm95_vm2, %v2583_v45  ;;  %2329 = vmatprep.subr.bf16.mxu0 %v2328_v32 }
 0x33e   :  { %2139 = vmatmul.mubr.msk.f32.vlgmr.msra.gmra.mrb[16].mxu1 %vm95_vm2, %v2575_v37 }
 0x33f   :  { %2331 = vmatpush3.bf16.msra.mxu0 %v2328_v32  ;;  %2171 = vmatprep.mubr.msk.f32.mxu1 %vm95_vm2, %v2542_v1  ;;  %v1866_v1 = vld [vmem:[%s2904_s5 + $0xd0] ss:$0 sm:$0xff]  ;;  %v1361_v32 = vld [vmem:[%s2904_s5 + $0x58] sm:$0xff] }
 0x342   :  { %2161 = vmatmul.mubr.msk.f32.vlgmr.msra.gmra.mrb[16].mxu0 %vm95_vm2, %v2581_v43 }
 0x343   :  { %2199 = vmatprep.mubr.msk.f32.mxu0 %vm704_vm12, %v2639_v9 }
 0x411   :  { %v2140_v33 = vpop.f32.mrb[16].mxu1 }
 0x412   :  { %v2771_v45 = vadd.f32 %v2140_v33, %v1852_v39  ;;  %v964_v35 = vpop.f32.mrb[17].mxu1 }
 0x413   :  { %v2773_v38 = vadd.f32 %v1852_v39, %v964_v35  ;;  %v1362_v39 = vld [vmem:[%s2904_s5 + $0x60] sm:$0xff] }
 0x414   :  { %v1158_v37 = vmax.f32 %v2771_v45, 0.0 }
 0x415   :  { %v1157_v43 = vmax.f32 %v2773_v38, 0.0  ;;  %v2162_v40 = vpop.f32.mrb[16].mxu0  ;;  %v2410_v38 = vmov 0.0|0.0  }
 0x416   :  { %v2780_v9 = vadd.f32 %v2162_v40, %v1866_v1  ;;  %v1142_v41 = vpop.f32.mrb[17].mxu0  ;;  %v1886_v40 = vld [vmem:[%s2904_s5 + $0xe8] sm:$0xff] }
 0x417   :  { %v2332_v42 = vpack.c.bf16 %v1158_v37, %v1157_v43  ;;  %v2786_v44 = vadd.f32 %v1866_v1, %v1142_v41  ;;  %v2368_v1 = vpack.c.bf16 %v1362_v39, %v1361_v32  ;;  %v1887_v41 = vld [vmem:[%s2904_s5 + $0xf0] sm:$0xff] }
 0x418   :  { %v1160_v46 = vmax.f32 %v2780_v9, 0.0 }
 0x419   :  { %v1159_v48 = vmax.f32 %v2786_v44, 0.0  ;;  %2333 = vmatprep.subr.bf16.mxu1 %v2332_v42 }
 0x41a   :  { %2335 = vmatpush3.bf16.msra.mxu1 %v2332_v42 }
 0x41b   :  { %v2336_v53 = vpack.c.bf16 %v1160_v46, %v1159_v48 }
 0x41d   :  { %2337 = vmatprep.subr.bf16.mxu1 %v2336_v53 }
 0x41e   :  { %2339 = vmatpush3.bf16.msra.mxu1 %v2336_v53 }
 0x421   :  { %2172 = vmatmul.mubr.msk.f32.vlgmr.msra.gmra.mrb[18].mxu1 %vm95_vm2, %v2590_v49  ;;  %v1363_v49 = vld [vmem:[%s2904_s5 + $0x68] sm:$0xff] }
 0x422   :  { %2174 = vmatprep.mubr.msk.f32.mxu1 %vm95_vm2, %v2594_v52  ;;  %v1364_v52 = vld [vmem:[%s2904_s5 + $0x70] sm:$0xff] }
 0x425   :  { %2175 = vmatmul.mubr.msk.f32.gmra.mrb[20].mxu1 %vm95_vm2, %v2602_v54  ;;  %v1365_v54 = vld [vmem:[%s2904_s5 + $0x78] sm:$0xff] }
 0x426   :  { %2177 = vmatprep.mubr.msk.f32.mxu1 %vm95_vm2, %v2606_v55  ;;  %v2356_v55 = vpack.c.bf16 %v1364_v52, %v1363_v49  ;;  %v2384_v49 = vpack.c.bf16 %v1887_v41, %v1886_v40 }
 0x428   :  { %2357 = vmatprep.subr.bf16.mxu1 %v2356_v55 }
 0x429   :  { %2178 = vmatmul.mubr.msk.f32.gmra.mrb[22].mxu1 %vm95_vm2, %v2614_v57  ;;  %v1366_v57 = vld [vmem:[%s2904_s5 + $0x80] sm:$0xff] }
 0x42a   :  { %2180 = vmatprep.mubr.msk.f32.mxu1 %vm95_vm2, %v2618_v59  ;;  %v2360_v59 = vpack.c.bf16 %v1366_v57, %v1365_v54  ;;  %2359 = vmatpush3.bf16.msra.mxu1 %v2356_v55 }
 0x42c   :  { %2361 = vmatprep.subr.bf16.mxu1 %v2360_v59 }
 0x42d   :  { %2181 = vmatmul.mubr.msk.f32.gmra.mrb[24].mxu1 %vm95_vm2, %v2625_v60 }
 0x42e   :  { %2363 = vmatpush3.bf16.msra.mxu1 %v2360_v59 }
 0x4f4   :  { %v2173_v60 = vpop.f32.mrb[18].mxu1 }
 0x4f5   :  { %v1233_v56 = vadd.f32 %v2173_v60, %v2668_v18  ;;  %v1227_v61 = vpop.f32.mrb[19].mxu1 }
 0x4f6   :  { %v1228_v62 = vadd.f32 %v1227_v61, %v2670_v19 }
 0x4f7   :  { %v1267_v63 = vmax.f32 %v1233_v56, 0.0 }
 0x4f8   :  { %v1266_v2 = vmax.f32 %v1228_v62, 0.0  ;;  %v2176_v58 = vpop.f32.mrb[20].mxu1  ;;  %v1717_v62 = vld [vmem:[%s2905_s3] sm:$0xf] }
 0x4f9   :  { %v1243_v3 = vadd.f32 %v2176_v58, %v2674_v25  ;;  %v1237_v4 = vpop.f32.mrb[21].mxu1 }
 0x4fa   :  { %v2340_v5 = vpack.c.bf16 %v1267_v63, %v1266_v2  ;;  %v1238_v6 = vadd.f32 %v1237_v4, %v2676_v27 }
 0x4fb   :  { %v1269_v50 = vmax.f32 %v1243_v3, 0.0 }
 0x4fc   :  { %v1268_v13 = vmax.f32 %v1238_v6, 0.0  ;;  %v2179_v14 = vpop.f32.mrb[22].mxu1  ;;  %2341 = vmatprep.subr.bf16.mxu0 %v2340_v5 }
 0x4fd   :  { %v1253_v15 = vadd.f32 %v2179_v14, %v2680_v34  ;;  %v1247_v7 = vpop.f32.mrb[23].mxu1  ;;  %2343 = vmatpush3.bf16.msra.mxu0 %v2340_v5  ;;  %v1888_v34 = vld [vmem:[%s2904_s5 + $0xf8] sm:$0xff] }
 0x4fe   :  { %v2344_v18 = vpack.c.bf16 %v1269_v50, %v1268_v13  ;;  %v1248_v19 = vadd.f32 %v1247_v7, %v2682_v36  ;;  %v1889_v36 = vld [vmem:[%s2904_s5 + $0x100] sm:$0xff] }
 0x4ff   :  { %v1271_v10 = vmax.f32 %v1253_v15, 0.0  ;;  %v2372_v26 = vpack.c.bf16 %v1889_v36, %v1888_v34 }
 0x500   :  { %v1270_v16 = vmax.f32 %v1248_v19, 0.0  ;;  %v2182_v17 = vpop.f32.mrb[24].mxu1  ;;  %2345 = vmatprep.subr.bf16.mxu0 %v2344_v18 }
 0x501   :  { %v1263_v25 = vadd.f32 %v2182_v17, %v2686_v47  ;;  %v1257_v20 = vpop.f32.mrb[25].mxu1  ;;  %2347 = vmatpush3.bf16.msra.mxu0 %v2344_v18  ;;  %v1359_v47 = vld [vmem:[%s2904_s5 + $0x48] sm:$0xff] }
 0x502   :  { %v2348_v27 = vpack.c.bf16 %v1271_v10, %v1270_v16  ;;  %v1258_v21 = vadd.f32 %v1257_v20, %v2688_v51  ;;  %v1360_v51 = vld [vmem:[%s2904_s5 + $0x50] sm:$0xff] }
 0x503   :  { %v1273_v22 = vmax.f32 %v1263_v25, 0.0 }
 0x504   :  { %v1272_v23 = vmax.f32 %v1258_v21, 0.0  ;;  %2349 = vmatprep.subr.bf16.mxu0 %v2348_v27 }
 0x505   :  { %2351 = vmatpush3.bf16.msra.mxu0 %v2348_v27 }
 0x506   :  { %v2352_v24 = vpack.c.bf16 %v1273_v22, %v1272_v23 }
 0x508   :  { %2353 = vmatprep.subr.bf16.mxu0 %v2352_v24 }
 0x509   :  { %2355 = vmatpush3.bf16.msra.mxu0 %v2352_v24 }
 0x50a   :  { %2373 = vmatprep.subr.bf16.mxu0 %v2372_v26 }
 0x50c   :  { %2200 = vmatmul.mubr.msk.f32.vlgmr.msra.gmra.mrb[18].mxu0 %vm704_vm12, %v2702_v11  ;;  %v2364_v11 = vpack.c.bf16 %v1360_v51, %v1359_v47 }
 0x50d   :  { %2202 = vmatprep.mubr.msk.f32.mxu0 %vm704_vm12, %v2708_v12  ;;  %2375 = vmatpush3.bf16.msra.mxu0 %v2372_v26  ;;  %v1891_v12 = vld [vmem:[%s2904_s5 + $0x110] sm:$0xff] }
 0x50e   :  { %v2376_v29 = vpack.c.bf16 %v1891_v12, %v1890_v28  ;;  %2365 = vmatprep.subr.bf16.mxu1 %v2364_v11 }
 0x510   :  { %2203 = vmatmul.mubr.msk.f32.gmra.mrb[20].mxu0 %vm704_vm12, %v2718_v8  ;;  %2377 = vmatprep.subr.bf16.mxu0 %v2376_v29  ;;  %v1884_v8 = vld [vmem:[%s2904_s5 + $0xd8] sm:$0xff] }
 0x511   :  { %2379 = vmatpush3.bf16.msra.mxu0 %v2376_v29  ;;  %v2380_v31 = vpack.c.bf16 %v1885_v30, %v1884_v8 }
 0x513   :  { %2381 = vmatprep.subr.bf16.mxu0 %v2380_v31 }
 0x5df   :  { %v2201_v33 = vpop.f32.mrb[18].mxu0 }
 0x5e0   :  { %v1340_v35 = vpop.f32.mrb[19].mxu0 }
 0x5e1   :  { %2213 = vmatprep.mubr.msk.f32.mxu1 %vm95_vm2, %v1340_v35 }
 0x5e2   :  { %2214 = vmatmul.mubr.msk.f32.vlgmr.msra.gmra.mrb[26].mxu1 %vm95_vm2, %v2201_v33 }
 0x5e3   :  { %v2204_v42 = vpop.f32.mrb[20].mxu0  ;;  %2367 = vmatpush3.bf16.msra.mxu1 %v2364_v11  ;;  %2224 = vmatprep.mubr.msk.f32.mxu1 %vm95_vm2, %v1157_v43  ;;  %v1883_v43 = vld [vmem:[%s2904_s5 + $0x88] ss:$0 sm:$0xff] }
 0x5e4   :  { %v1350_v53 = vpop.f32.mrb[21].mxu0  ;;  %2369 = vmatprep.subr.bf16.mxu1 %v2368_v1 }
 0x5e5   :  { %2235 = vmatprep.mubr.msk.f32.mxu0 %vm95_vm2, %v1350_v53 }
 0x5e6   :  { %2236 = vmatmul.mubr.msk.f32.vlgmr.msra.gmra.mrb[22].mxu0 %vm95_vm2, %v2204_v42 }
 0x5e7   :  { %2371 = vmatpush3.bf16.msra.mxu1 %v2368_v1  ;;  %2383 = vmatpush3.bf16.msra.mxu0 %v2380_v31 }
 0x5e8   :  { %2246 = vmatprep.mubr.msk.f32.mxu0 %vm95_vm2, %v1159_v48  ;;  %2385 = vmatprep.subr.bf16.mxu0 %v2384_v49 }
 0x5e9   :  { %2388 = vmatprep.subr.bf16.mxu1 %v2410_v38 }
 0x5ea   :  { %2225 = vmatmul.mubr.msk.f32.vlgmr.msra.gmra.mrb[26].mxu1 %vm95_vm2, %v1158_v37  ;;  %v1897_v37 = vld [vmem:[%s2904_s5 + $0x118] ss:$0 sm:$0xff] }
 0x5eb   :  { %2387 = vmatpush3.bf16.msra.mxu0 %v2384_v49  ;;  %2257 = vmatprep.mubr.msk.f32.mxu1 %vm2411_vm0, %v2409_v0 }
 0x5ee   :  { %2247 = vmatmul.mubr.msk.f32.vlgmr.msra.gmra.mrb[22].mxu0 %vm95_vm2, %v1160_v46 }
 0x6bd   :  { %v2226_v44 = vpop.f32.mrb[26].mxu1 }
 0x6be   :  { %v1535_v48 = vadd.f32 %v2226_v44, %v1883_v43  ;;  %v1521_v52 = vpop.f32.mrb[27].mxu1 }
 0x6bf   :  { %v1534_v45 = vadd.f32 %v1883_v43, %v1521_v52 }
 0x6c0   :  { %v1714_v9 = vmax.f32 %v1535_v48, 0.0 }
 0x6c1   :  { %v1713_v54 = vmax.f32 %v1534_v45, 0.0  ;;  %v2248_v46 = vpop.f32.mrb[22].mxu0 }
 0x6c2   :  { %v1712_v55 = vadd.f32 %v2248_v46, %v1897_v37  ;;  %v1698_v57 = vpop.f32.mrb[23].mxu0 }
 0x6c3   :  { %v2389_v59 = vpack.c.bf16 %v1714_v9, %v1713_v54  ;;  %v1711_v60 = vadd.f32 %v1897_v37, %v1698_v57 }
 0x6c4   :  { %v1716_v0 = vmax.f32 %v1712_v55, 0.0 }
 0x6c5   :  { %v1715_v56 = vmax.f32 %v1711_v60, 0.0  ;;  %2390 = vmatpush3.bf16.msra.mxu1 %v2389_v59 }
 0x6c6   :  { %2391 = vmatprep.subr.bf16.mxu1 %v2410_v38 }
 0x6c7   :  { %v2392_v61 = vpack.c.bf16 %v1716_v0, %v1715_v56 }
 0x6c9   :  { %2393 = vmatpush3.bf16.msra.mxu1 %v2392_v61 }
 0x6cc   :  { %2258 = vmatmul.mubr.msk.f32.vlgmr.msra.gmra.mrb[28].mxu1 %vm95_vm2, %v1717_v62 }
 0x79f   :  { %v1787_v63 = vpop.f32.mrb[28].mxu1 }
 0x7a0   :  { %1792 = vst.msk [vmem:[%s2906_s6] sm:$0xf] %vm1791_vm1, %v1787_v63  ;;  %v2259_v2 = vpop.f32.mrb[29].mxu1 }

</bundles_post_ra>
